<compile_context>
chip_gen: v7x
topology: tpu7x:2x2x1
jax: 0.10.0
libtpu: 0.0.40
codegen_flags: <defaults>
</compile_context>

<pallas_src>
import jax
import jax.numpy as jnp
from jax.experimental import pallas as pl
from jax.experimental.pallas import tpu as pltpu

# (out_features, in_features) per layer, same as the PyTorch `networkshape`
NETWORKSHAPE = [(26, 12), (18, 26), (6, 18), (3, 6), (1, 3)]
NUM_LAYERS = len(NETWORKSHAPE)
LANE = 128


def ann_mlp_kernel(x_ref, *refs):
    """Transposed-layout MLP forward.

    x_ref : (in0, TB)  f32   — one batch tile of X^T
    refs  : (w0, b0, ..., w4, b4, out_ref)
      w_i : (out_i, in_i) bf16  (PyTorch layout, pre-cast)
      b_i : (out_i, 1)    f32
      out : (1, TB)       f32
    """
    out_ref = refs[-1]
    param_refs = refs[:-1]
    n_layers = len(param_refs) // 2

    h = x_ref[...]                                   # (in0, TB) f32
    for i in range(n_layers):
        w = param_refs[2 * i][...]                   # (out_i, in_i) bf16
        b = param_refs[2 * i + 1][...]               # (out_i, 1)    f32
        # MXU: bf16 x bf16 -> f32 accumulate; bias add + tanh stay in f32.
        h = jnp.dot(w, h.astype(jnp.bfloat16),
                    preferred_element_type=jnp.float32) + b
        if i < n_layers - 1:                         # activation between layers only
            h = jnp.tanh(h)
    out_ref[...] = h.astype(out_ref.dtype)


def make_params(key):
    """Deterministic parameter init mimicking torch.nn.Linear defaults
    (uniform in [-1/sqrt(fan_in), 1/sqrt(fan_in)]).  PyTorch layout: (out, in)."""
    params = []
    for (out_f, in_f) in NETWORKSHAPE:
        key, kw, kb = jax.random.split(key, 3)
        bound = 1.0 / (in_f ** 0.5)
        w = jax.random.uniform(kw, (out_f, in_f), jnp.float32, -bound, bound)
        b = jax.random.uniform(kb, (out_f,), jnp.float32, -bound, bound)
        params.append((w, b))
    return params


def prepare_kernel_params(params):
    """One-time layout prep (hoisted out of the per-forward hot path):
    weights -> bf16 (out, in) for the MXU; biases -> f32 (out, 1) for lane broadcast."""
    flat = []
    for (w, b) in params:
        flat.append(jnp.asarray(w, jnp.bfloat16))                  # (out, in) bf16
        flat.append(jnp.asarray(b, jnp.float32).reshape(-1, 1))    # (out, 1)  f32
    return tuple(flat)


def _round_up(n, m):
    return ((n + m - 1) // m) * m


def ann_model_forward(x, flat_params, *, block_batch=1024):
    """Pallas-backed forward pass. x: (batch, 12) f32 -> (batch, 1) f32."""
    batch = x.shape[0]
    in_f = NETWORKSHAPE[0][1]
    out_f = NETWORKSHAPE[-1][0]

    # Pad batch to a lane-dense multiple of the tile size, transpose once.
    padded = _round_up(max(batch, LANE), LANE)
    tb = min(block_batch, padded)
    padded = _round_up(padded, tb)
    num_tiles = padded // tb

    x_t = jnp.pad(x.astype(jnp.float32), ((0, padded - batch), (0, 0))).T  # (12, padded)

    # BlockSpecs: tile X^T / out along the batch (lane) axis; params stay resident.
    in_specs = [pl.BlockSpec((in_f, tb), lambda i: (0, i))]
    for p in flat_params:
        in_specs.append(pl.BlockSpec(p.shape, lambda i: (0, 0)))
    out_spec = pl.BlockSpec((out_f, tb), lambda i: (0, i))

    # Advisory cost estimate (per padded batch).
    flops = 2 * padded * sum(o * i for (o, i) in NETWORKSHAPE)
    transcendentals = padded * sum(o for (o, _) in NETWORKSHAPE[:-1])
    param_bytes = sum(int(p.size) * p.dtype.itemsize for p in flat_params)
    bytes_accessed = padded * (in_f + out_f) * 4 + param_bytes

    out_t = pl.pallas_call(
        ann_mlp_kernel,
        out_shape=jax.ShapeDtypeStruct((out_f, padded), jnp.float32),
        grid=(num_tiles,),
        in_specs=in_specs,
        out_specs=out_spec,
        compiler_params=pltpu.CompilerParams(
            dimension_semantics=("parallel",)),
        cost_estimate=pl.CostEstimate(
            flops=flops,
            transcendentals=transcendentals,
            bytes_accessed=bytes_accessed),
    )(x_t, *flat_params)

    # Back to the PyTorch-facing (batch, 1) layout; drop padding columns.
    return out_t[:, :batch].T


def reference_forward(x, params):
    """Pure-JAX reference in the natural (batch, features) layout, with the same
    bf16-input / f32-accumulate matmul quantization as the kernel."""
    h = x.astype(jnp.float32)
    for i, (w, b) in enumerate(params):
        h = jnp.dot(h.astype(jnp.bfloat16), jnp.asarray(w, jnp.bfloat16).T,
                    preferred_element_type=jnp.float32) + b
        if i < NUM_LAYERS - 1:
            h = jnp.tanh(h)
    return h


if __name__ == "__main__":
    key = jax.random.PRNGKey(0)
    key, kx = jax.random.split(key)

    batch = 8
    x = jax.random.normal(kx, (batch, NETWORKSHAPE[0][1]), jnp.float32)  # (8, 12)

    params = make_params(key)
    flat_params = prepare_kernel_params(params)   # one-time layout prep

    out = ann_model_forward(x, flat_params)
    out = jax.block_until_ready(out)

    ref = reference_forward(x, params)
    assert out.shape == (batch, NETWORKSHAPE[-1][0]), out.shape
    assert jnp.allclose(out, ref, atol=1e-3, rtol=1e-3), "mismatch vs reference"

    # TODO(synk): Linear_maxN.mask_weight / row_swap weight-pruning only fires during
    # training at rounds==3000; it does not affect a single eval forward, so it is omitted.
    print("KERNEL_OK")
</pallas_src>

<mosaic_0001>
module attributes {stable_mosaic.version = 11 : i64} {
  func.func @ann_mlp_kernel(%arg0: i32, %arg1: memref<12x128xf32, #tpu.memory_space<vmem>>, %arg2: memref<26x12xbf16, #tpu.memory_space<vmem>>, %arg3: memref<26x1xf32, #tpu.memory_space<vmem>>, %arg4: memref<18x26xbf16, #tpu.memory_space<vmem>>, %arg5: memref<18x1xf32, #tpu.memory_space<vmem>>, %arg6: memref<6x18xbf16, #tpu.memory_space<vmem>>, %arg7: memref<6x1xf32, #tpu.memory_space<vmem>>, %arg8: memref<3x6xbf16, #tpu.memory_space<vmem>>, %arg9: memref<3x1xf32, #tpu.memory_space<vmem>>, %arg10: memref<1x3xbf16, #tpu.memory_space<vmem>>, %arg11: memref<1x1xf32, #tpu.memory_space<vmem>>, %arg12: memref<1x128xf32, #tpu.memory_space<vmem>>) attributes {dimension_semantics = [#tpu.dimension_semantics<parallel>], iteration_bounds = array<i64: 1>, scalar_prefetch = 0 : i64, scratch_operands = 0 : i64, tpu.core_type = #tpu.core_type<tc>, window_params = [{transform_indices = @transform_0, window_bounds = array<i64: 12, 128>}, {pipeline_mode = #tpu.pipeline_mode<synchronous>, transform_indices = @transform_1, window_bounds = array<i64: 26, 12>}, {pipeline_mode = #tpu.pipeline_mode<synchronous>, transform_indices = @transform_2, window_bounds = array<i64: 26, 1>}, {pipeline_mode = #tpu.pipeline_mode<synchronous>, transform_indices = @transform_3, window_bounds = array<i64: 18, 26>}, {pipeline_mode = #tpu.pipeline_mode<synchronous>, transform_indices = @transform_4, window_bounds = array<i64: 18, 1>}, {pipeline_mode = #tpu.pipeline_mode<synchronous>, transform_indices = @transform_5, window_bounds = array<i64: 6, 18>}, {pipeline_mode = #tpu.pipeline_mode<synchronous>, transform_indices = @transform_6, window_bounds = array<i64: 6, 1>}, {pipeline_mode = #tpu.pipeline_mode<synchronous>, transform_indices = @transform_7, window_bounds = array<i64: 3, 6>}, {pipeline_mode = #tpu.pipeline_mode<synchronous>, transform_indices = @transform_8, window_bounds = array<i64: 3, 1>}, {pipeline_mode = #tpu.pipeline_mode<synchronous>, transform_indices = @transform_9, window_bounds = array<i64: 1, 3>}, {pipeline_mode = #tpu.pipeline_mode<synchronous>, transform_indices = @transform_10, window_bounds = array<i64: 1, 1>}, {transform_indices = @transform_11, window_bounds = array<i64: 1, 128>}]} {
    %c0 = arith.constant 0 : index
    %c0_0 = arith.constant 0 : index
    %0 = vector.load %arg1[%c0, %c0_0] : memref<12x128xf32, #tpu.memory_space<vmem>>, vector<12x128xf32>
    %c0_1 = arith.constant 0 : index
    %c0_2 = arith.constant 0 : index
    %1 = vector.load %arg2[%c0_1, %c0_2] : memref<26x12xbf16, #tpu.memory_space<vmem>>, vector<26x12xbf16>
    %c0_3 = arith.constant 0 : index
    %c0_4 = arith.constant 0 : index
    %2 = vector.load %arg3[%c0_3, %c0_4] : memref<26x1xf32, #tpu.memory_space<vmem>>, vector<26x1xf32>
    %3 = arith.truncf %0 : vector<12x128xf32> to vector<12x128xbf16>
    %cst = arith.constant dense<0.000000e+00> : vector<26x128xf32>
    %4 = tpu.matmul %1, %3, %cst {dimension_numbers = #tpu.dot_dimension_numbers<[1], [0], [0], [1], [0, 0, 1, 1], [], []>} : vector<26x12xbf16>, vector<12x128xbf16>, vector<26x128xf32> -> vector<26x128xf32>
    %5 = vector.broadcast %2 : vector<26x1xf32> to vector<26x128xf32>
    %6 = arith.addf %4, %5 : vector<26x128xf32>
    %7 = math.tanh %6 : vector<26x128xf32>
    %c0_5 = arith.constant 0 : index
    %c0_6 = arith.constant 0 : index
    %8 = vector.load %arg4[%c0_5, %c0_6] : memref<18x26xbf16, #tpu.memory_space<vmem>>, vector<18x26xbf16>
    %c0_7 = arith.constant 0 : index
    %c0_8 = arith.constant 0 : index
    %9 = vector.load %arg5[%c0_7, %c0_8] : memref<18x1xf32, #tpu.memory_space<vmem>>, vector<18x1xf32>
    %10 = arith.truncf %7 : vector<26x128xf32> to vector<26x128xbf16>
    %cst_9 = arith.constant dense<0.000000e+00> : vector<18x128xf32>
    %11 = tpu.matmul %8, %10, %cst_9 {dimension_numbers = #tpu.dot_dimension_numbers<[1], [0], [0], [1], [0, 0, 1, 1], [], []>} : vector<18x26xbf16>, vector<26x128xbf16>, vector<18x128xf32> -> vector<18x128xf32>
    %12 = vector.broadcast %9 : vector<18x1xf32> to vector<18x128xf32>
    %13 = arith.addf %11, %12 : vector<18x128xf32>
    %14 = math.tanh %13 : vector<18x128xf32>
    %c0_10 = arith.constant 0 : index
    %c0_11 = arith.constant 0 : index
    %15 = vector.load %arg6[%c0_10, %c0_11] : memref<6x18xbf16, #tpu.memory_space<vmem>>, vector<6x18xbf16>
    %c0_12 = arith.constant 0 : index
    %c0_13 = arith.constant 0 : index
    %16 = vector.load %arg7[%c0_12, %c0_13] : memref<6x1xf32, #tpu.memory_space<vmem>>, vector<6x1xf32>
    %17 = arith.truncf %14 : vector<18x128xf32> to vector<18x128xbf16>
    %cst_14 = arith.constant dense<0.000000e+00> : vector<6x128xf32>
    %18 = tpu.matmul %15, %17, %cst_14 {dimension_numbers = #tpu.dot_dimension_numbers<[1], [0], [0], [1], [0, 0, 1, 1], [], []>} : vector<6x18xbf16>, vector<18x128xbf16>, vector<6x128xf32> -> vector<6x128xf32>
    %19 = vector.broadcast %16 : vector<6x1xf32> to vector<6x128xf32>
    %20 = arith.addf %18, %19 : vector<6x128xf32>
    %21 = math.tanh %20 : vector<6x128xf32>
    %c0_15 = arith.constant 0 : index
    %c0_16 = arith.constant 0 : index
    %22 = vector.load %arg8[%c0_15, %c0_16] : memref<3x6xbf16, #tpu.memory_space<vmem>>, vector<3x6xbf16>
    %c0_17 = arith.constant 0 : index
    %c0_18 = arith.constant 0 : index
    %23 = vector.load %arg9[%c0_17, %c0_18] : memref<3x1xf32, #tpu.memory_space<vmem>>, vector<3x1xf32>
    %24 = arith.truncf %21 : vector<6x128xf32> to vector<6x128xbf16>
    %cst_19 = arith.constant dense<0.000000e+00> : vector<3x128xf32>
    %25 = tpu.matmul %22, %24, %cst_19 {dimension_numbers = #tpu.dot_dimension_numbers<[1], [0], [0], [1], [0, 0, 1, 1], [], []>} : vector<3x6xbf16>, vector<6x128xbf16>, vector<3x128xf32> -> vector<3x128xf32>
    %26 = vector.broadcast %23 : vector<3x1xf32> to vector<3x128xf32>
    %27 = arith.addf %25, %26 : vector<3x128xf32>
    %28 = math.tanh %27 : vector<3x128xf32>
    %c0_20 = arith.constant 0 : index
    %c0_21 = arith.constant 0 : index
    %29 = vector.load %arg10[%c0_20, %c0_21] : memref<1x3xbf16, #tpu.memory_space<vmem>>, vector<1x3xbf16>
    %c0_22 = arith.constant 0 : index
    %c0_23 = arith.constant 0 : index
    %30 = vector.load %arg11[%c0_22, %c0_23] : memref<1x1xf32, #tpu.memory_space<vmem>>, vector<1x1xf32>
    %31 = arith.truncf %28 : vector<3x128xf32> to vector<3x128xbf16>
    %cst_24 = arith.constant dense<0.000000e+00> : vector<1x128xf32>
    %32 = tpu.matmul %29, %31, %cst_24 {dimension_numbers = #tpu.dot_dimension_numbers<[1], [0], [0], [1], [0, 0, 1, 1], [], []>} : vector<1x3xbf16>, vector<3x128xbf16>, vector<1x128xf32> -> vector<1x128xf32>
    %33 = vector.broadcast %30 : vector<1x1xf32> to vector<1x128xf32>
    %34 = arith.addf %32, %33 : vector<1x128xf32>
    %c0_25 = arith.constant 0 : index
    %c0_26 = arith.constant 0 : index
    %35 = vector.load %arg12[%c0_25, %c0_26] : memref<1x128xf32, #tpu.memory_space<vmem>>, vector<1x128xf32>
    tpu.vector_store %arg12[%c0_25, %c0_26], %34 {strides = array<i32>} : memref<1x128xf32, #tpu.memory_space<vmem>>, vector<1x128xf32>,
    return
  }
  func.func @transform_0(%arg0: i32) -> (i32, i32) {
    %c0_i32 = arith.constant 0 : i32
    %c0_i32_0 = arith.constant 0 : i32
    return %c0_i32, %arg0 : i32, i32
  }
  func.func @transform_1(%arg0: i32) -> (i32, i32) {
    %c0_i32 = arith.constant 0 : i32
    %c0_i32_0 = arith.constant 0 : i32
    %c0_i32_1 = arith.constant 0 : i32
    return %c0_i32, %c0_i32_0 : i32, i32
  }
  func.func @transform_2(%arg0: i32) -> (i32, i32) {
    %c0_i32 = arith.constant 0 : i32
    %c0_i32_0 = arith.constant 0 : i32
    %c0_i32_1 = arith.constant 0 : i32
    return %c0_i32, %c0_i32_0 : i32, i32
  }
  func.func @transform_3(%arg0: i32) -> (i32, i32) {
    %c0_i32 = arith.constant 0 : i32
    %c0_i32_0 = arith.constant 0 : i32
    %c0_i32_1 = arith.constant 0 : i32
    return %c0_i32, %c0_i32_0 : i32, i32
  }
  func.func @transform_4(%arg0: i32) -> (i32, i32) {
    %c0_i32 = arith.constant 0 : i32
    %c0_i32_0 = arith.constant 0 : i32
    %c0_i32_1 = arith.constant 0 : i32
    return %c0_i32, %c0_i32_0 : i32, i32
  }
  func.func @transform_5(%arg0: i32) -> (i32, i32) {
    %c0_i32 = arith.constant 0 : i32
    %c0_i32_0 = arith.constant 0 : i32
    %c0_i32_1 = arith.constant 0 : i32
    return %c0_i32, %c0_i32_0 : i32, i32
  }
  func.func @transform_6(%arg0: i32) -> (i32, i32) {
    %c0_i32 = arith.constant 0 : i32
    %c0_i32_0 = arith.constant 0 : i32
    %c0_i32_1 = arith.constant 0 : i32
    return %c0_i32, %c0_i32_0 : i32, i32
  }
  func.func @transform_7(%arg0: i32) -> (i32, i32) {
    %c0_i32 = arith.constant 0 : i32
    %c0_i32_0 = arith.constant 0 : i32
    %c0_i32_1 = arith.constant 0 : i32
    return %c0_i32, %c0_i32_0 : i32, i32
  }
  func.func @transform_8(%arg0: i32) -> (i32, i32) {
    %c0_i32 = arith.constant 0 : i32
    %c0_i32_0 = arith.constant 0 : i32
    %c0_i32_1 = arith.constant 0 : i32
    return %c0_i32, %c0_i32_0 : i32, i32
  }
  func.func @transform_9(%arg0: i32) -> (i32, i32) {
    %c0_i32 = arith.constant 0 : i32
    %c0_i32_0 = arith.constant 0 : i32
    %c0_i32_1 = arith.constant 0 : i32
    return %c0_i32, %c0_i32_0 : i32, i32
  }
  func.func @transform_10(%arg0: i32) -> (i32, i32) {
    %c0_i32 = arith.constant 0 : i32
    %c0_i32_0 = arith.constant 0 : i32
    %c0_i32_1 = arith.constant 0 : i32
    return %c0_i32, %c0_i32_0 : i32, i32
  }
  func.func @transform_11(%arg0: i32) -> (i32, i32) {
    %c0_i32 = arith.constant 0 : i32
    %c0_i32_0 = arith.constant 0 : i32
    return %c0_i32, %arg0 : i32, i32
  }
}

</mosaic_0001>

<bundles_post_ra>
// kernel: tpu_custom_call.1
= control target key start
LH: loop header
LB: loop body
LE: loop exit
PB: predicated region body
PF: predicated region fallthrough
CT: control target
= control target key end

     0   :  { %s687_s0 = inlined_call_operand.vmem [shape: f32[12,128], index: 0, kind: input, shape index: {}]   ;;  %s688_s1 = inlined_call_operand.vmem [shape: bf16[26,12], index: 1, kind: input, shape index: {}]   ;;  %s689_s2 = inlined_call_operand.vmem [shape: f32[26,1], index: 2, kind: input, shape index: {}]   ;;  %s690_s3 = inlined_call_operand.vmem [shape: bf16[18,26], index: 3, kind: input, shape index: {}]   ;;  %s691_s4 = inlined_call_operand.vmem [shape: f32[18,1], index: 4, kind: input, shape index: {}]   ;;  %s692_s5 = inlined_call_operand.vmem [shape: bf16[6,18], index: 5, kind: input, shape index: {}]   ;;  %s693_s6 = inlined_call_operand.vmem [shape: f32[6,1], index: 6, kind: input, shape index: {}]   ;;  %s694_s7 = inlined_call_operand.vmem [shape: bf16[3,6], index: 7, kind: input, shape index: {}]   ;;  %s695_s8 = inlined_call_operand.vmem [shape: f32[3,1], index: 8, kind: input, shape index: {}]   ;;  %s696_s9 = inlined_call_operand.vmem [shape: bf16[1,3], index: 9, kind: input, shape index: {}]   ;;  %s697_s10 = inlined_call_operand.<no memory space> [shape: f32[1,1], index: 10, kind: input, shape index: {}]   ;;  %s698_s11 = inlined_call_operand.hbm [shape: f32[1,128], index: 11, kind: output, shape index: {}]  }
   0x1   :  { %v16_v0 = vstv %s697_s10 }
   0x2   :  { %17 = vst [vmem:[#allocation2] sm:$0x1] %v16_v0 }
   0x3   :  { %v42_v1 = vld [vmem:[%s687_s0] sm:$0xff]  ;;  %v43_v2 = vld [vmem:[%s687_s0 + $0x8] sm:$0xf]  ;;  %vm90_vm0 = vcmask 1045504   ;;  %vm83_vm1 = vcmask 97280   ;;  %v50_v8 = vld [vmem:[%s689_s2 + $0x10] sm:$0xff] }
   0x4   :  { %v52_v3 = vpack.c.bf16 %v43_v2, %v42_v1  ;;  %v500_v4 = vld [vmem:[%s688_s1] sm:$0xff]   ;;  %v501_v7 = vld [vmem:[%s688_s1 + $0x8] sm:$0x1f]   ;;  %v546_v9 = vmov 0   ;;  %v51_v11 = vld [vmem:[%s689_s2 + $0x18] sm:$0x3] }
   0x5   :  { %v48_v5 = vld [vmem:[%s689_s2] sm:$0xff]  ;;  %459 = vmatprep.mubr.msk.bf16.mxu0 %vm83_vm1, %v500_v4  ;;  %498 = vset.pattern.permute.xlu0 %v546_v9  ;;  %v49_v10 = vld [vmem:[%s689_s2 + $0x8] sm:$0xff] }
   0x6   :  { %491 = vmatprep.subr.msk.bf16.mxu0 %vm90_vm0, %v52_v3  ;;  %v92_v6 = vsel %vm90_vm0, %v52_v3, 0  ;;  %55 = vperm.xlu0 %498, %v48_v5  }
   0x7   :  { %458 = vmatpush3.bf16.msra.mxu0 %v92_v6  ;;  %499 = vset.pattern.permute.xlu1 %v546_v9 }
   0x8   :  { %65 = vperm.xlu1 %499, %v50_v8  }
   0xa   :  { %460 = vmatmul.mubr.msk.bf16.vlgmr.msra.gmra.mrb[0].mxu0 %vm83_vm1, %v501_v7 }
   0xb   :  { %18 = vsyncpa [#allocation4], 0  ;;  %60 = vperm.xlu0 %498, %v49_v10   ;;  %v150_v12 = vld [vmem:[%s691_s4] sm:$0xff]  ;;  %v151_v13 = vld [vmem:[%s691_s4 + $0x8] sm:$0xff]  ;;  %vm178_vm2 = vcmask 211968   ;;  %vm185_vm3 = vcmask 1044480  }
   0xc   :  { %70 = vperm.xlu1 %499, %v51_v11   ;;  %v152_v14 = vld [vmem:[%s691_s4 + $0x10] sm:$0x3]  ;;  %v241_v15 = vld [vmem:[%s693_s6] sm:$0x3f]  ;;  %v547_v39 = vmov 0.0   ;;  %vm548_vm4 = vmmov 0  }
   0xd   :  { %v299_v16 = vld [vmem:[%s695_s8] sm:$0x7]  ;;  %v503_v38 = vld [vmem:[%s690_s3 + $0x8] ss:$0 sps:$4 sm:$0x11]   ;;  %471 = vmatprep.subr.bf16.mxu0 %v547_v39  ;;  %475 = vmatprep.mubr.msk.bf16.mxu0 %vm548_vm4, %v547_v39  ;;  %vm253_vm5 = vcmask 1040384  }
   0xe   :  { %v356_v17 = vld [vmem:[#allocation2] sm:$0x1]  ;;  %vm249_vm6 = vcmask 146432   ;;  %vm310_vm7 = vcmask 1042432   ;;  %vm306_vm8 = vcmask 48128   ;;  %vm371_vm9 = vcmask 1041408  }
   0xf   :  { %157 = vperm.xlu0 %498, %v150_v12   ;;  %v502_v18 = vld [vmem:[%s690_s3] sm:$0xff]   ;;  %v549_v9 = vmov 65535   ;;  %vm367_vm10 = vcmask 23552   ;;  %s550_s26 = smov [#allocation3]  }
  0x10   :  { %162 = vperm.xlu1 %499, %v151_v13   ;;  %467 = vmatprep.mubr.msk.bf16.mxu1 %vm178_vm2, %v502_v18  ;;  %v240_v56 = vld [vmem:[%s692_s5] sm:$0x7]  ;;  %v372_v10 = vsel %vm253_vm5, 4294967295, %v549_v9  ;;  %s424_s10 = sshll.u32 %s550_s26, 4  ;;  %s425_s10 = int_to_ptr.vmem [resolvable:$true] %s424_s10 }
  0x11   :  { %v298_v2 = vld [vmem:[%s694_s7] sm:$0x3]  ;;  %v373_v12 = vsel %vm371_vm9, %v372_v10, 0  ;;  %s522_s27 = scalar_lea.vmem %s425_s10, 16  ;;  %s526_s28 = scalar_lea.vmem %s425_s10, 32 }
  0x12   :  { %p523_p0 = scmp.ne.s32.totalorder %s425_s10, %s522_s27  ;;  %p527_p1 = scmp.lt.s32.totalorder %s425_s10, %s425_s10 }
  0x13   :  { %167 = vperm.xlu0 %498, %v152_v14   ;;  %p528_p2 = scmp.lt.s32.totalorder %s526_s28, %s522_s27 }
  0x14   :  { %246 = vperm.xlu1 %499, %v241_v15   ;;  %v355_v15 = vld [vmem:[%s696_s9] sm:$0x1] }
  0x15   :  { %p529_p3 = por %p528_p2, %p527_p1 }
  0x17   :  { %303 = vperm.xlu0 %498, %v299_v16   ;;  %v363_v16 = vlaneseq  ;;  %p530_p4 = pnand %p529_p3, %p523_p0 }
  0x18   :  { %360 = vperm.xlu1 %499, %v356_v17  }
  0x19   :  { %v364_v17 = vshrl.u32 %v363_v16, 7 }
  0x1b   :  { %v365_v18 = vsub.s32 0, %v364_v17 }
  0x85   :  { %v56_v20 = vpop.permute.xlu0 %55 }
  0x87   :  { %v66_v19 = vpop.permute.xlu1 %65 }
  0x8a   :  { %v61_v27 = vpop.permute.xlu0 %60 }
  0x8b   :  { %v71_v24 = vpop.permute.xlu1 %70 }
  0x8e   :  { %v158_v40 = vpop.permute.xlu0 %157 }
  0x8f   :  { %v163_v47 = vpop.permute.xlu1 %162 }
  0x92   :  { %v168_v41 = vpop.permute.xlu0 %167 }
  0x93   :  { %v247_v57 = vpop.permute.xlu1 %246 }
  0x96   :  { %v304_v3 = vpop.permute.xlu0 %303 }
  0xdd   :  { %v461_v21 = vpop.f32.mrb[0].mxu0 }
  0xde   :  { %v137_v22 = vadd.f32 %v461_v21, %v66_v19  ;;  %v128_v23 = vpop.f32.mrb[1].mxu0  ;;  %v361_v19 = vpop.permute.xlu1 %360 }
  0xdf   :  { %v129_v25 = vadd.f32 %v128_v23, %v56_v20  ;;  %v462_v26 = vpop.f32.mrb[2].mxu0  ;;  %v366_v20 = vrot.slane %v361_v19, %v365_v18 }
  0xe0   :  { %504 = vtanh.f32 %v137_v22  ;;  %v140_v28 = vadd.f32 %v462_v26, %v71_v24  ;;  %v131_v29 = vpop.f32.mrb[3].mxu0 }
  0xe1   :  { %506 = vtanh.f32 %v129_v25  ;;  %v132_v30 = vadd.f32 %v131_v29, %v61_v27 }
  0xe2   :  { %508 = vtanh.f32 %v140_v28 }
  0xe3   :  { %510 = vtanh.f32 %v132_v30 }
  0xea   :  { %v505_v31 = vpop.eup %504 }
  0xeb   :  { %v507_v32 = vpop.eup %506 }
  0xec   :  { %v509_v33 = vpop.eup %508 }
  0xed   :  { %v511_v34 = vpop.eup %510  ;;  %v154_v35 = vpack.c.bf16 %v509_v33, %v505_v31 }
  0xee   :  { %v153_v36 = vpack.c.bf16 %v511_v34, %v507_v32 }
  0xef   :  { %v187_v37 = vsel %vm185_vm3, %v154_v35, 0 }
  0xf0   :  { %463 = vmatprep.subr.bf16.mxu1 %v153_v36 }
  0xf1   :  { %464 = vmatpush3.bf16.msra.mxu1 %v153_v36 }
  0xf2   :  { %492 = vmatprep.subr.msk.bf16.mxu1 %vm185_vm3, %v154_v35 }
  0xf5   :  { %466 = vmatpush3.bf16.msra.mxu1 %v187_v37 }
  0xf6   :  { %479 = vmatprep.subr.bf16.mxu1 %v547_v39 }
  0xf8   :  { %468 = vmatmul.mubr.msk.bf16.vlgmr.msra.gmra.mrb[0].mxu1 %vm178_vm2, %v503_v38 }
  0xf9   :  { %481 = vmatprep.mubr.msk.bf16.mxu1 %vm548_vm4, %v547_v39 }
 0x1cb   :  { %v469_v42 = vpop.f32.mrb[0].mxu1 }
 0x1cc   :  { %v232_v43 = vadd.f32 %v469_v42, %v168_v41  ;;  %v223_v44 = vpop.f32.mrb[1].mxu1 }
 0x1cd   :  { %v224_v45 = vadd.f32 %v223_v44, %v158_v40  ;;  %v470_v46 = vpop.f32.mrb[2].mxu1 }
 0x1ce   :  { %v226_v48 = vpop.f32.mrb[3].mxu1  ;;  %512 = vtanh.f32 %v232_v43 }
 0x1cf   :  { %v227_v49 = vadd.f32 %v226_v48, %v163_v47  ;;  %514 = vtanh.f32 %v224_v45 }
 0x1d1   :  { %516 = vtanh.f32 %v227_v49 }
 0x1d8   :  { %v513_v50 = vpop.eup %512 }
 0x1d9   :  { %v515_v51 = vpop.eup %514  ;;  %v243_v54 = vpack.c.bf16 %v513_v50, %v513_v50 }
 0x1db   :  { %v517_v52 = vpop.eup %516  ;;  %v255_v55 = vsel %vm253_vm5, %v243_v54, 0 }
 0x1dc   :  { %v242_v53 = vpack.c.bf16 %v517_v52, %v515_v51 }
 0x1de   :  { %472 = vmatpush3.bf16.msra.mxu0 %v242_v53 }
 0x1df   :  { %473 = vmatprep.subr.bf16.mxu0 %v547_v39 }
 0x1e2   :  { %474 = vmatpush3.bf16.msra.mxu0 %v255_v55 }
 0x1e3   :  { %485 = vmatprep.subr.bf16.mxu0 %v547_v39 }
 0x1e5   :  { %476 = vmatmul.mubr.msk.bf16.vlgmr.msra.gmra.mrb[4].mxu0 %vm249_vm6, %v240_v56 }
 0x1e6   :  { %487 = vmatprep.mubr.msk.bf16.mxu0 %vm548_vm4, %v547_v39 }
 0x2b8   :  { %v291_v58 = vpop.f32.mrb[4].mxu0 }
 0x2b9   :  { %v292_v59 = vadd.f32 %v291_v58, %v247_v57  ;;  %v477_v60 = vpop.f32.mrb[5].mxu0 }
 0x2ba   :  { %v294_v61 = vpop.f32.mrb[6].mxu0 }
 0x2bb   :  { %518 = vtanh.f32 %v292_v59  ;;  %v478_v62 = vpop.f32.mrb[7].mxu0 }
 0x2c5   :  { %v519_v63 = vpop.eup %518 }
 0x2c6   :  { %v300_v0 = vpack.c.bf16 %v519_v63, %v519_v63 }
 0x2c8   :  { %v312_v1 = vsel %vm310_vm7, %v300_v0, 0 }
 0x2c9   :  { %480 = vmatpush3.bf16.msra.mxu1 %v312_v1 }
 0x2cc   :  { %482 = vmatmul.mubr.msk.bf16.vlgmr.msra.gmra.mrb[4].mxu1 %vm306_vm8, %v298_v2 }
 0x39f   :  { %v348_v4 = vpop.f32.mrb[4].mxu1 }
 0x3a0   :  { %v349_v5 = vadd.f32 %v348_v4, %v304_v3  ;;  %v483_v6 = vpop.f32.mrb[5].mxu1 }
 0x3a1   :  { %v351_v7 = vpop.f32.mrb[6].mxu1 }
 0x3a2   :  { %520 = vtanh.f32 %v349_v5  ;;  %v484_v8 = vpop.f32.mrb[7].mxu1 }
 0x3ac   :  { %v521_v11 = vpop.eup %520 }
 0x3ad   :  { %v357_v13 = vpack.c.bf16 %v521_v11, %v521_v11 }
 0x3af   :  { %v375_v14 = vand.u32 %v373_v12, %v357_v13 }
 0x3b1   :  { %486 = vmatpush3.bf16.msra.mxu0 %v375_v14 }
 0x3b4   :  { %488 = vmatmul.mubr.msk.bf16.vlgmr.msra.gmra.mrb[8].mxu0 %vm367_vm10, %v355_v15 }
 0x487   :  { %v411_v21 = vpop.f32.mrb[8].mxu0 }
 0x488   :  { %v412_v22 = vadd.f32 %v411_v21, %v366_v20  ;;  %v489_v23 = vpop.f32.mrb[9].mxu0 }
 0x489   :  { %v414_v24 = vpop.f32.mrb[10].mxu0 }
 0x48a   :  { %417 = vst [vmem:[#allocation3] sm:$0x1] %v412_v22  ;;  %v490_v25 = vpop.f32.mrb[11].mxu0 }
 0x48b   :  { %533 = shalt.err (!%p530_p4)
}
 0x48c   :  { %s534_s29 = scalar_lea.hbm %s698_s11, 16 }
 0x48d   :  { %p535_p5 = scmp.ne.s32.totalorder %s698_s11, %s534_s29  ;;  %p538_p6 = scmp.lt.u32.totalorder %s534_s29, %s698_s11 }
 0x48f   :  { %p540_p7 = pnand %p538_p6, %p535_p5 }
 0x491   :  { %543 = shalt.err (!%p540_p7)
}
 0x492   :  { %427 = dma.vmem_to_hbm [thread:$0]  %s425_s10, 16, %s698_s11, [#allocation4]  }
 0x493   :  { %544 = dma.done.wait [#allocation4], 16  }
 0x494   :  { %545 = vsyncadd [#allocation4], 4294967280 }
 0x495   :  { %431 = vsyncpa [#allocation4], 1 }

</bundles_post_ra>
